<compile_context>
chip_gen: v7x
topology: tpu7x:2x2x1
jax: 0.10.0
libtpu: 0.0.40
codegen_flags: <defaults>
</compile_context>

<pallas_src>
import math

import jax
import jax.numpy as jnp
from jax.experimental import pallas as pl
from jax.experimental.pallas import tpu as pltpu

EMBEDDING_SIZE = 866
PREV_CTX = 1
FUT_CTX = 1
INPUT_SIZE = EMBEDDING_SIZE * (PREV_CTX + FUT_CTX + 1)   # 2598
HIDDEN_LAYERS = [128, 64]
NUM_CLASSES = 16
BATCH = 8

LANE = 128
BF16_SUBLANE = 16   # bf16 packs [16,128] per vreg


def _round_up(x, m):
    return (x + m - 1) // m * m


# Lane-dense padded dims.
K0_PAD = _round_up(INPUT_SIZE, LANE)        # 2688 = 21 * 128
H1_PAD = _round_up(HIDDEN_LAYERS[0], LANE)  # 128
H2_PAD = _round_up(HIDDEN_LAYERS[1], LANE)  # 128
C_PAD = _round_up(NUM_CLASSES, LANE)        # 128


def _ffnn_kernel(x_ref, w1_ref, b1_ref, w2_ref, b2_ref, w3_ref, b3_ref, o_ref):
    """Fused 3-layer MLP on one batch tile.

    relu(x @ W1 + b1) @ W2 + b2 -> relu -> @ W3 + b3.
    x and weights arrive as bf16; matmuls accumulate in f32 on the MXU;
    bias-add / ReLU stay f32 on the VPU. Intermediates are vreg/VMEM-resident.
    """
    h1 = jnp.dot(x_ref[...], w1_ref[...], preferred_element_type=jnp.float32)
    h1 = jnp.maximum(h1 + b1_ref[...], 0.0)

    h2 = jnp.dot(h1.astype(jnp.bfloat16), w2_ref[...],
                 preferred_element_type=jnp.float32)
    h2 = jnp.maximum(h2 + b2_ref[...], 0.0)

    y = jnp.dot(h2.astype(jnp.bfloat16), w3_ref[...],
                preferred_element_type=jnp.float32)
    o_ref[...] = (y + b3_ref[...]).astype(o_ref.dtype)


def pack_params(params):
    """Pad weights/biases to lane-dense shapes; weights bf16, biases f32."""
    (w1, b1), (w2, b2), (w3, b3) = params

    def pad_w(w, k_pad, n_pad):
        w = jnp.pad(w, ((0, k_pad - w.shape[0]), (0, n_pad - w.shape[1])))
        return w.astype(jnp.bfloat16)

    def pad_b(b, n_pad):
        return jnp.pad(b, ((0, 0), (0, n_pad - b.shape[1]))).astype(jnp.float32)

    return (pad_w(w1, K0_PAD, H1_PAD), pad_b(b1, H1_PAD),
            pad_w(w2, H1_PAD, H2_PAD), pad_b(b2, H2_PAD),
            pad_w(w3, H2_PAD, C_PAD), pad_b(b3, C_PAD))


@jax.jit
def ffnn_forward(x, packed):
    """Fused Pallas forward. x: (B, INPUT_SIZE) f32 -> (B, NUM_CLASSES) f32."""
    w1, b1, w2, b2, w3, b3 = packed
    B, K = x.shape

    # Batch tiling: 16-multiple rows (bf16 sublane packing), up to 512 rows
    # per grid step; for big batches prefer >=2 tiles so the "parallel" axis
    # maps onto both TensorCores on v7x.
    b_pad = _round_up(max(B, BF16_SUBLANE), BF16_SUBLANE)
    tm = min(b_pad, 512)
    if b_pad // tm < 2 and b_pad >= 2 * BF16_SUBLANE:
        tm = _round_up(b_pad // 2, BF16_SUBLANE)
    b_pad = _round_up(b_pad, tm)
    grid = (b_pad // tm,)

    # Single fused XLA op: cast x to bf16 and zero-pad to (b_pad, K0_PAD).
    x_pad = jnp.pad(x.astype(jnp.bfloat16),
                    ((0, b_pad - B), (0, K0_PAD - K)))

    x_spec_kwargs = {}
    if grid[0] > 2:
        # Deeper pipelining on the streamed x tiles only (weights are resident).
        x_spec_kwargs["pipeline_mode"] = pl.Buffered(3)
    x_spec = pl.BlockSpec((tm, K0_PAD), lambda i: (i, 0), **x_spec_kwargs)

    bytes_accessed = (
        b_pad * K0_PAD * 2                       # x (bf16)
        + (K0_PAD * H1_PAD + H1_PAD * H2_PAD + H2_PAD * C_PAD) * 2  # W bf16
        + (H1_PAD + H2_PAD + C_PAD) * 4          # biases f32
        + b_pad * C_PAD * 4                      # out f32
    )
    cost = pl.CostEstimate(
        flops=2 * b_pad * (K0_PAD * H1_PAD + H1_PAD * H2_PAD + H2_PAD * C_PAD),
        transcendentals=0,
        bytes_accessed=bytes_accessed,
    )

    out = pl.pallas_call(
        _ffnn_kernel,
        out_shape=jax.ShapeDtypeStruct((b_pad, C_PAD), jnp.float32),
        grid=grid,
        in_specs=[
            x_spec,                                             # x batch tile (bf16)
            pl.BlockSpec((K0_PAD, H1_PAD), lambda i: (0, 0)),   # W1 (resident)
            pl.BlockSpec((1, H1_PAD), lambda i: (0, 0)),        # b1
            pl.BlockSpec((H1_PAD, H2_PAD), lambda i: (0, 0)),   # W2
            pl.BlockSpec((1, H2_PAD), lambda i: (0, 0)),        # b2
            pl.BlockSpec((H2_PAD, C_PAD), lambda i: (0, 0)),    # W3
            pl.BlockSpec((1, C_PAD), lambda i: (0, 0)),         # b3
        ],
        out_specs=pl.BlockSpec((tm, C_PAD), lambda i: (i, 0)),
        compiler_params=pltpu.CompilerParams(
            dimension_semantics=("parallel",),   # batch tiles split across TCs
        ),
        cost_estimate=cost,
    )(x_pad, w1, b1, w2, b2, w3, b3)

    # TODO(synk): in a full model, hand the padded (b_pad, C_PAD) logits
    # directly to the consumer fusion instead of slicing here (saves one op).
    return out[:B, :NUM_CLASSES]


def init_params(key):
    """Mirror nn.Linear default init: uniform(-1/sqrt(fan_in), 1/sqrt(fan_in)).

    Weights are stored as (in_features, out_features) == W_pytorch.T so the
    kernel computes y = x @ W + b directly.
    """
    sizes = [INPUT_SIZE] + HIDDEN_LAYERS + [NUM_CLASSES]
    params = []
    for i in range(len(sizes) - 1):
        fan_in, fan_out = sizes[i], sizes[i + 1]
        key, kw, kb = jax.random.split(key, 3)
        bound = 1.0 / math.sqrt(fan_in)
        w = jax.random.uniform(kw, (fan_in, fan_out), jnp.float32, -bound, bound)
        b = jax.random.uniform(kb, (1, fan_out), jnp.float32, -bound, bound)
        params.append((w, b))
    return params


def ffnn_forward_ref(x, params):
    """Pure-JAX reference with the same bf16-operand / f32-accumulate numerics."""
    n_layers = len(params)
    for i, (w, b) in enumerate(params):
        x = jnp.dot(x.astype(jnp.bfloat16), w.astype(jnp.bfloat16),
                    preferred_element_type=jnp.float32) + b
        if i != n_layers - 1:
            x = jnp.maximum(x, 0.0)
    return x


if __name__ == "__main__":
    key = jax.random.PRNGKey(0)
    kx, kp = jax.random.split(key)

    # Deterministic synthetic input (stands in for the concatenated one-hot
    # context embedding of size 3 * 866 = 2598).
    x = jax.random.uniform(kx, (BATCH, INPUT_SIZE), jnp.float32)
    params = init_params(kp)
    packed = pack_params(params)

    out = ffnn_forward(x, packed)
    out = jax.block_until_ready(out)

    ref = ffnn_forward_ref(x, params)
    assert out.shape == (BATCH, NUM_CLASSES)
    assert jnp.allclose(out, ref, atol=5e-3, rtol=5e-3), "mismatch vs JAX reference"

    print("KERNEL_OK")
</pallas_src>

<mosaic_0001>
module attributes {stable_mosaic.version = 11 : i64} {
  func.func @_ffnn_kernel(%arg0: i32, %arg1: memref<16x2688xbf16, #tpu.memory_space<vmem>>, %arg2: memref<2688x128xbf16, #tpu.memory_space<vmem>>, %arg3: memref<1x128xf32, #tpu.memory_space<vmem>>, %arg4: memref<128x128xbf16, #tpu.memory_space<vmem>>, %arg5: memref<1x128xf32, #tpu.memory_space<vmem>>, %arg6: memref<128x128xbf16, #tpu.memory_space<vmem>>, %arg7: memref<1x128xf32, #tpu.memory_space<vmem>>, %arg8: memref<16x128xf32, #tpu.memory_space<vmem>>) attributes {dimension_semantics = [#tpu.dimension_semantics<parallel>], iteration_bounds = array<i64: 1>, scalar_prefetch = 0 : i64, scratch_operands = 0 : i64, tpu.core_type = #tpu.core_type<tc>, window_params = [{transform_indices = @transform_0, window_bounds = array<i64: 16, 2688>}, {pipeline_mode = #tpu.pipeline_mode<synchronous>, transform_indices = @transform_1, window_bounds = array<i64: 2688, 128>}, {pipeline_mode = #tpu.pipeline_mode<synchronous>, transform_indices = @transform_2, window_bounds = array<i64: 1, 128>}, {pipeline_mode = #tpu.pipeline_mode<synchronous>, transform_indices = @transform_3, window_bounds = array<i64: 128, 128>}, {pipeline_mode = #tpu.pipeline_mode<synchronous>, transform_indices = @transform_4, window_bounds = array<i64: 1, 128>}, {pipeline_mode = #tpu.pipeline_mode<synchronous>, transform_indices = @transform_5, window_bounds = array<i64: 128, 128>}, {pipeline_mode = #tpu.pipeline_mode<synchronous>, transform_indices = @transform_6, window_bounds = array<i64: 1, 128>}, {transform_indices = @transform_7, window_bounds = array<i64: 16, 128>}]} {
    %c0 = arith.constant 0 : index
    %c0_0 = arith.constant 0 : index
    %0 = vector.load %arg1[%c0, %c0_0] : memref<16x2688xbf16, #tpu.memory_space<vmem>>, vector<16x2688xbf16>
    %c0_1 = arith.constant 0 : index
    %c0_2 = arith.constant 0 : index
    %1 = vector.load %arg2[%c0_1, %c0_2] : memref<2688x128xbf16, #tpu.memory_space<vmem>>, vector<2688x128xbf16>
    %cst = arith.constant dense<0.000000e+00> : vector<16x128xf32>
    %2 = tpu.matmul %0, %1, %cst {dimension_numbers = #tpu.dot_dimension_numbers<[1], [0], [0], [1], [0, 0, 1, 1], [], []>} : vector<16x2688xbf16>, vector<2688x128xbf16>, vector<16x128xf32> -> vector<16x128xf32>
    %c0_3 = arith.constant 0 : index
    %c0_4 = arith.constant 0 : index
    %3 = vector.load %arg3[%c0_3, %c0_4] : memref<1x128xf32, #tpu.memory_space<vmem>>, vector<1x128xf32>
    %4 = vector.broadcast %3 : vector<1x128xf32> to vector<16x128xf32>
    %5 = arith.addf %2, %4 : vector<16x128xf32>
    %cst_5 = arith.constant 0.000000e+00 : f32
    %6 = vector.broadcast %cst_5 : f32 to vector<16x128xf32>
    %7 = arith.maximumf %5, %6 : vector<16x128xf32>
    %8 = arith.truncf %7 : vector<16x128xf32> to vector<16x128xbf16>
    %c0_6 = arith.constant 0 : index
    %c0_7 = arith.constant 0 : index
    %9 = vector.load %arg4[%c0_6, %c0_7] : memref<128x128xbf16, #tpu.memory_space<vmem>>, vector<128x128xbf16>
    %cst_8 = arith.constant dense<0.000000e+00> : vector<16x128xf32>
    %10 = tpu.matmul %8, %9, %cst_8 {dimension_numbers = #tpu.dot_dimension_numbers<[1], [0], [0], [1], [0, 0, 1, 1], [], []>} : vector<16x128xbf16>, vector<128x128xbf16>, vector<16x128xf32> -> vector<16x128xf32>
    %c0_9 = arith.constant 0 : index
    %c0_10 = arith.constant 0 : index
    %11 = vector.load %arg5[%c0_9, %c0_10] : memref<1x128xf32, #tpu.memory_space<vmem>>, vector<1x128xf32>
    %12 = vector.broadcast %11 : vector<1x128xf32> to vector<16x128xf32>
    %13 = arith.addf %10, %12 : vector<16x128xf32>
    %cst_11 = arith.constant 0.000000e+00 : f32
    %14 = vector.broadcast %cst_11 : f32 to vector<16x128xf32>
    %15 = arith.maximumf %13, %14 : vector<16x128xf32>
    %16 = arith.truncf %15 : vector<16x128xf32> to vector<16x128xbf16>
    %c0_12 = arith.constant 0 : index
    %c0_13 = arith.constant 0 : index
    %17 = vector.load %arg6[%c0_12, %c0_13] : memref<128x128xbf16, #tpu.memory_space<vmem>>, vector<128x128xbf16>
    %cst_14 = arith.constant dense<0.000000e+00> : vector<16x128xf32>
    %18 = tpu.matmul %16, %17, %cst_14 {dimension_numbers = #tpu.dot_dimension_numbers<[1], [0], [0], [1], [0, 0, 1, 1], [], []>} : vector<16x128xbf16>, vector<128x128xbf16>, vector<16x128xf32> -> vector<16x128xf32>
    %c0_15 = arith.constant 0 : index
    %c0_16 = arith.constant 0 : index
    %19 = vector.load %arg7[%c0_15, %c0_16] : memref<1x128xf32, #tpu.memory_space<vmem>>, vector<1x128xf32>
    %20 = vector.broadcast %19 : vector<1x128xf32> to vector<16x128xf32>
    %21 = arith.addf %18, %20 : vector<16x128xf32>
    %c0_17 = arith.constant 0 : index
    %c0_18 = arith.constant 0 : index
    %22 = vector.load %arg8[%c0_17, %c0_18] : memref<16x128xf32, #tpu.memory_space<vmem>>, vector<16x128xf32>
    tpu.vector_store %arg8[%c0_17, %c0_18], %21 {strides = array<i32>} : memref<16x128xf32, #tpu.memory_space<vmem>>, vector<16x128xf32>,
    return
  }
  func.func @transform_0(%arg0: i32) -> (i32, i32) {
    %c0_i32 = arith.constant 0 : i32
    %c0_i32_0 = arith.constant 0 : i32
    return %arg0, %c0_i32 : i32, i32
  }
  func.func @transform_1(%arg0: i32) -> (i32, i32) {
    %c0_i32 = arith.constant 0 : i32
    %c0_i32_0 = arith.constant 0 : i32
    %c0_i32_1 = arith.constant 0 : i32
    return %c0_i32, %c0_i32_0 : i32, i32
  }
  func.func @transform_2(%arg0: i32) -> (i32, i32) {
    %c0_i32 = arith.constant 0 : i32
    %c0_i32_0 = arith.constant 0 : i32
    %c0_i32_1 = arith.constant 0 : i32
    return %c0_i32, %c0_i32_0 : i32, i32
  }
  func.func @transform_3(%arg0: i32) -> (i32, i32) {
    %c0_i32 = arith.constant 0 : i32
    %c0_i32_0 = arith.constant 0 : i32
    %c0_i32_1 = arith.constant 0 : i32
    return %c0_i32, %c0_i32_0 : i32, i32
  }
  func.func @transform_4(%arg0: i32) -> (i32, i32) {
    %c0_i32 = arith.constant 0 : i32
    %c0_i32_0 = arith.constant 0 : i32
    %c0_i32_1 = arith.constant 0 : i32
    return %c0_i32, %c0_i32_0 : i32, i32
  }
  func.func @transform_5(%arg0: i32) -> (i32, i32) {
    %c0_i32 = arith.constant 0 : i32
    %c0_i32_0 = arith.constant 0 : i32
    %c0_i32_1 = arith.constant 0 : i32
    return %c0_i32, %c0_i32_0 : i32, i32
  }
  func.func @transform_6(%arg0: i32) -> (i32, i32) {
    %c0_i32 = arith.constant 0 : i32
    %c0_i32_0 = arith.constant 0 : i32
    %c0_i32_1 = arith.constant 0 : i32
    return %c0_i32, %c0_i32_0 : i32, i32
  }
  func.func @transform_7(%arg0: i32) -> (i32, i32) {
    %c0_i32 = arith.constant 0 : i32
    %c0_i32_0 = arith.constant 0 : i32
    return %arg0, %c0_i32 : i32, i32
  }
}

</mosaic_0001>

<bundles_post_ra>
// kernel: ffnn_forward.1
= control target key start
LH: loop header
LB: loop body
LE: loop exit
PB: predicated region body
PF: predicated region fallthrough
CT: control target
= control target key end

     0   :  { %12 = vsyncpa [#allocation3], 0  ;;  %s2967_s24 = smov [#allocation2]   ;;  %s3180_s0 = inlined_call_operand.vmem [shape: bf16[16,2688], index: 0, kind: input, shape index: {}]   ;;  %s3181_s1 = inlined_call_operand.hbm [shape: bf16[2688,128], index: 1, kind: input, shape index: {}]   ;;  %s3182_s2 = inlined_call_operand.vmem [shape: f32[1,128], index: 2, kind: input, shape index: {}]   ;;  %s3183_s3 = inlined_call_operand.vmem [shape: bf16[128,128], index: 3, kind: input, shape index: {}]   ;;  %s3184_s4 = inlined_call_operand.vmem [shape: f32[1,128], index: 4, kind: input, shape index: {}]   ;;  %s3185_s5 = inlined_call_operand.vmem [shape: bf16[128,128], index: 5, kind: input, shape index: {}]   ;;  %s3186_s6 = inlined_call_operand.vmem [shape: f32[1,128], index: 6, kind: input, shape index: {}]   ;;  %s3187_s7 = inlined_call_operand.vmem [shape: f32[16,128], index: 7, kind: output, shape index: {}]  }
   0x1   :  { %s20_s25 = sshll.u32 %s2967_s24, 4  ;;  %s2943_s28 = scalar_lea.hbm %s3181_s1, 21504  ;;  %s21_s25 = int_to_ptr.vmem [resolvable:$true] %s20_s25 }
   0x2   :  { %p2944_p0 = scmp.ne.s32.totalorder %s3181_s1, %s2943_s28  ;;  %p2947_p1 = scmp.lt.u32.totalorder %s2943_s28, %s3181_s1 }
   0x4   :  { %p2949_p2 = pnand %p2947_p1, %p2944_p0 }
   0x6   :  { %2952 = shalt.err (!%p2949_p2)
}
   0x7   :  { %s2953_s10 = scalar_lea.vmem %s21_s25, 21504  ;;  %p2958_p4 = scmp.lt.s32.totalorder %s21_s25, %s21_s25 }
   0x8   :  { %p2954_p3 = scmp.ne.s32.totalorder %s21_s25, %s2953_s10  ;;  %p2959_p5 = scmp.lt.s32.totalorder %s2953_s10, %s2953_s10 }
   0xa   :  { %p2960_p6 = por %p2959_p5, %p2958_p4 }
   0xc   :  { %p2961_p7 = pnand %p2960_p6, %p2954_p3 }
   0xe   :  { %2964 = shalt.err (!%p2961_p7)
}
   0xf   :  { %s2968_s11 = smov 64   ;;  %s2969_s12 = smov 4  }
  0x10   :  { %26 = dma.hbm_to_vmem [thread:$0]  %s3181_s1, 21504, %s21_s25, [#allocation3], %s2968_s11, %s2968_s11, %s2969_s12  }
  0x11   :  { %2965 = dma.done.wait [#allocation3], 21504  }
  0x12   :  { %2966 = vsyncadd [#allocation3], 4294945792  ;;  %v2728_v0 = vld [vmem:[#allocation2 + $0x40] sm:$0xff]   ;;  %v2732_v4 = vld [vmem:[#allocation2 + $0x48] sm:$0xff]   ;;  %vm2971_vm0 = vmmov 0  }
  0x13   :  { %v2729_v1 = vld [vmem:[#allocation2] sm:$0xff]   ;;  %2416 = vmatprep.subr.bf16.mxu0 %v2728_v0  ;;  %v2733_v5 = vld [vmem:[#allocation2 + $0x8] sm:$0xff]   ;;  %v2736_v8 = vld [vmem:[#allocation2 + $0x50] sm:$0xff]  }
  0x14   :  { %v2730_v2 = vld [vmem:[#allocation2 + $0xc0] sm:$0xff]   ;;  %2417 = vmatpush3.bf16.msra.mxu0 %v2729_v1  ;;  %v2734_v6 = vld [vmem:[#allocation2 + $0xc8] sm:$0xff]   ;;  %v2737_v9 = vld [vmem:[#allocation2 + $0x10] sm:$0xff]  }
  0x15   :  { %v2731_v3 = vld [vmem:[#allocation2 + $0x80] sm:$0xff]   ;;  %2438 = vmatprep.subr.bf16.mxu1 %v2730_v2  ;;  %2418 = vmatprep.subr.bf16.mxu0 %v2732_v4  ;;  %v2735_v7 = vld [vmem:[#allocation2 + $0x88] sm:$0xff]   ;;  %v2738_v10 = vld [vmem:[#allocation2 + $0xd0] sm:$0xff]  }
  0x16   :  { %2439 = vmatpush3.bf16.msra.mxu1 %v2731_v3  ;;  %v2739_v11 = vld [vmem:[#allocation2 + $0x90] sm:$0xff]   ;;  %v2740_v12 = vld [vmem:[#allocation2 + $0x58] sm:$0xff]   ;;  %v2744_v16 = vld [vmem:[#allocation2 + $0x60] sm:$0xff]  }
  0x17   :  { %2440 = vmatprep.subr.bf16.mxu1 %v2734_v6  ;;  %v2741_v13 = vld [vmem:[#allocation2 + $0x18] sm:$0xff]   ;;  %v2745_v17 = vld [vmem:[#allocation2 + $0x20] sm:$0xff]   ;;  %v2748_v20 = vld [vmem:[#allocation2 + $0x68] sm:$0xff]  }
  0x18   :  { %2419 = vmatpush3.bf16.msra.mxu0 %v2733_v5  ;;  %v2742_v14 = vld [vmem:[#allocation2 + $0xd8] sm:$0xff]   ;;  %v2746_v18 = vld [vmem:[#allocation2 + $0xe0] sm:$0xff]   ;;  %v2749_v21 = vld [vmem:[#allocation2 + $0x28] sm:$0xff]  }
  0x19   :  { %2420 = vmatprep.subr.bf16.mxu0 %v2736_v8  ;;  %v2743_v15 = vld [vmem:[#allocation2 + $0x98] sm:$0xff]   ;;  %v2747_v19 = vld [vmem:[#allocation2 + $0xa0] sm:$0xff]   ;;  %v2750_v22 = vld [vmem:[#allocation2 + $0xe8] sm:$0xff]  }
  0x1a   :  { %2441 = vmatpush3.bf16.msra.mxu1 %v2735_v7  ;;  %v2751_v23 = vld [vmem:[#allocation2 + $0xa8] sm:$0xff]   ;;  %v2752_v24 = vld [vmem:[#allocation2 + $0x70] sm:$0xff]   ;;  %v2756_v28 = vld [vmem:[#allocation2 + $0x78] sm:$0xff]  }
  0x1b   :  { %2442 = vmatprep.subr.bf16.mxu1 %v2738_v10  ;;  %v2753_v25 = vld [vmem:[#allocation2 + $0x30] sm:$0xff]   ;;  %v2757_v29 = vld [vmem:[#allocation2 + $0x38] sm:$0xff]   ;;  %v2763_v34 = vld [vmem:[#allocation2 + $0x140] sm:$0xff]  }
  0x1c   :  { %2421 = vmatpush3.bf16.msra.mxu0 %v2737_v9  ;;  %v2754_v26 = vld [vmem:[#allocation2 + $0xf0] sm:$0xff]   ;;  %v2758_v30 = vld [vmem:[#allocation2 + $0xf8] sm:$0xff]   ;;  %v2766_v36 = vld [vmem:[%s3180_s0 + $0xc] ss:$84 sps:$4 sm:$0xff]  }
  0x1d   :  { %2422 = vmatprep.subr.bf16.mxu0 %v2740_v12  ;;  %v2755_v27 = vld [vmem:[#allocation2 + $0xb0] sm:$0xff]   ;;  %v2761_v32 = vld [vmem:[%s3180_s0 + $0x4] ss:$84 sps:$4 sm:$0xff]   ;;  %v2764_v35 = vld [vmem:[%s3180_s0 + $0x8] ss:$84 sps:$4 sm:$0xff]   ;;  %1593 = vmatprep.mubr.bf16.mxu1 %v2766_v36 }
  0x1e   :  { %2443 = vmatpush3.bf16.msra.mxu1 %v2739_v11  ;;  %v2759_v31 = vld [vmem:[%s3180_s0] ss:$84 sps:$4 sm:$0xff]   ;;  %v2762_v33 = vld [vmem:[#allocation2 + $0xb8] sm:$0xff]   ;;  %1552 = vmatprep.mubr.bf16.mxu0 %v2761_v32  ;;  %v2770_v40 = vld [vmem:[#allocation2 + $0x148] sm:$0xff]  }
  0x1f   :  { %2444 = vmatprep.subr.bf16.mxu1 %v2742_v14  ;;  %v2767_v37 = vld [vmem:[#allocation2 + $0x100] sm:$0xff]   ;;  %v2771_v41 = vld [vmem:[#allocation2 + $0x108] sm:$0xff]   ;;  %v2774_v44 = vld [vmem:[#allocation2 + $0x150] sm:$0xff]  }
  0x20   :  { %2423 = vmatpush3.bf16.msra.mxu0 %v2741_v13  ;;  %v2768_v38 = vld [vmem:[#allocation2 + $0x1c0] sm:$0xff]   ;;  %v2772_v42 = vld [vmem:[#allocation2 + $0x1c8] sm:$0xff]   ;;  %v2775_v45 = vld [vmem:[#allocation2 + $0x110] sm:$0xff]  }
  0x21   :  { %2424 = vmatprep.subr.bf16.mxu0 %v2744_v16  ;;  %v2769_v39 = vld [vmem:[#allocation2 + $0x180] sm:$0xff]   ;;  %v2773_v43 = vld [vmem:[#allocation2 + $0x188] sm:$0xff]   ;;  %v2776_v46 = vld [vmem:[#allocation2 + $0x1d0] sm:$0xff]  }
  0x22   :  { %2445 = vmatpush3.bf16.msra.mxu1 %v2743_v15  ;;  %v2777_v47 = vld [vmem:[#allocation2 + $0x190] sm:$0xff]   ;;  %v2778_v48 = vld [vmem:[#allocation2 + $0x158] sm:$0xff]   ;;  %v2782_v52 = vld [vmem:[#allocation2 + $0x160] sm:$0xff]  }
  0x23   :  { %2446 = vmatprep.subr.bf16.mxu1 %v2746_v18  ;;  %v2779_v49 = vld [vmem:[#allocation2 + $0x118] sm:$0xff]   ;;  %v2783_v53 = vld [vmem:[#allocation2 + $0x120] sm:$0xff]   ;;  %v2786_v56 = vld [vmem:[#allocation2 + $0x168] sm:$0xff]  }
  0x24   :  { %2425 = vmatpush3.bf16.msra.mxu0 %v2745_v17  ;;  %v2780_v50 = vld [vmem:[#allocation2 + $0x1d8] sm:$0xff]   ;;  %v2784_v54 = vld [vmem:[#allocation2 + $0x1e0] sm:$0xff]   ;;  %v2787_v57 = vld [vmem:[#allocation2 + $0x128] sm:$0xff]  }
  0x25   :  { %2426 = vmatprep.subr.bf16.mxu0 %v2748_v20  ;;  %v2781_v51 = vld [vmem:[#allocation2 + $0x198] sm:$0xff]   ;;  %v2785_v55 = vld [vmem:[#allocation2 + $0x1a0] sm:$0xff]   ;;  %v2788_v58 = vld [vmem:[#allocation2 + $0x1e8] sm:$0xff]  }
  0x26   :  { %2447 = vmatpush3.bf16.msra.mxu1 %v2747_v19  ;;  %v2789_v59 = vld [vmem:[#allocation2 + $0x1a8] sm:$0xff]   ;;  %v2790_v60 = vld [vmem:[#allocation2 + $0x170] sm:$0xff]   ;;  %v2794_v0 = vld [vmem:[#allocation2 + $0x178] sm:$0xff]  }
  0x27   :  { %2448 = vmatprep.subr.bf16.mxu1 %v2750_v22  ;;  %v2791_v61 = vld [vmem:[#allocation2 + $0x130] sm:$0xff]   ;;  %v2795_v1 = vld [vmem:[#allocation2 + $0x138] sm:$0xff]   ;;  %v2801_v6 = vld [vmem:[#allocation2 + $0x240] sm:$0xff]  }
  0x28   :  { %2427 = vmatpush3.bf16.msra.mxu0 %v2749_v21  ;;  %v2792_v62 = vld [vmem:[#allocation2 + $0x1f0] sm:$0xff]   ;;  %v2796_v2 = vld [vmem:[#allocation2 + $0x1f8] sm:$0xff]   ;;  %v2805_v9 = vld [vmem:[#allocation2 + $0x200] sm:$0xff]  }
  0x29   :  { %2428 = vmatprep.subr.bf16.mxu0 %v2752_v24  ;;  %v2793_v63 = vld [vmem:[#allocation2 + $0x1b0] sm:$0xff]   ;;  %v2800_v5 = vld [vmem:[#allocation2 + $0x1b8] sm:$0xff]   ;;  %v2806_v10 = vld [vmem:[#allocation2 + $0x2c0] sm:$0xff]  }
  0x2a   :  { %2449 = vmatpush3.bf16.msra.mxu1 %v2751_v23  ;;  %v2797_v3 = vld [vmem:[%s3180_s0 + $0x10] ss:$84 sps:$4 sm:$0xff]   ;;  %v2799_v4 = vld [vmem:[%s3180_s0 + $0x14] ss:$84 sps:$4 sm:$0xff]   ;;  %v2802_v7 = vld [vmem:[%s3180_s0 + $0x18] ss:$84 sps:$4 sm:$0xff]  }
  0x2b   :  { %2450 = vmatprep.subr.bf16.mxu1 %v2754_v26  ;;  %v2804_v8 = vld [vmem:[%s3180_s0 + $0x1c] ss:$84 sps:$4 sm:$0xff]   ;;  %v2807_v11 = vld [vmem:[#allocation2 + $0x280] sm:$0xff]   ;;  %v2808_v12 = vld [vmem:[#allocation2 + $0x248] sm:$0xff]  }
  0x2c   :  { %2429 = vmatpush3.bf16.msra.mxu0 %v2753_v25  ;;  %v2809_v13 = vld [vmem:[#allocation2 + $0x208] sm:$0xff]   ;;  %v2812_v16 = vld [vmem:[#allocation2 + $0x250] sm:$0xff]   ;;  %v2816_v20 = vld [vmem:[#allocation2 + $0x258] sm:$0xff]  }
  0x2d   :  { %2430 = vmatprep.subr.bf16.mxu0 %v2756_v28  ;;  %v2810_v14 = vld [vmem:[#allocation2 + $0x2c8] sm:$0xff]   ;;  %v2813_v17 = vld [vmem:[#allocation2 + $0x210] sm:$0xff]   ;;  %v2817_v21 = vld [vmem:[#allocation2 + $0x218] sm:$0xff]  }
  0x2e   :  { %2451 = vmatpush3.bf16.msra.mxu1 %v2755_v27  ;;  %v2811_v15 = vld [vmem:[#allocation2 + $0x288] sm:$0xff]   ;;  %v2814_v18 = vld [vmem:[#allocation2 + $0x2d0] sm:$0xff]   ;;  %v2818_v22 = vld [vmem:[#allocation2 + $0x2d8] sm:$0xff]  }
  0x2f   :  { %2452 = vmatprep.subr.bf16.mxu1 %v2758_v30  ;;  %v2815_v19 = vld [vmem:[#allocation2 + $0x290] sm:$0xff]   ;;  %v2819_v23 = vld [vmem:[#allocation2 + $0x298] sm:$0xff]   ;;  %v2820_v24 = vld [vmem:[#allocation2 + $0x260] sm:$0xff]  }
  0x30   :  { %2431 = vmatpush3.bf16.msra.mxu0 %v2757_v29  ;;  %v2821_v25 = vld [vmem:[#allocation2 + $0x220] sm:$0xff]   ;;  %v2824_v28 = vld [vmem:[#allocation2 + $0x268] sm:$0xff]   ;;  %v2828_v32 = vld [vmem:[#allocation2 + $0x270] sm:$0xff]  }
  0x31   :  { %2460 = vmatprep.subr.bf16.mxu0 %v2763_v34  ;;  %v2822_v26 = vld [vmem:[#allocation2 + $0x2e0] sm:$0xff]   ;;  %v2825_v29 = vld [vmem:[#allocation2 + $0x228] sm:$0xff]   ;;  %v2830_v34 = vld [vmem:[#allocation2 + $0x2f0] sm:$0xff]  }
  0x32   :  { %2453 = vmatpush3.bf16.msra.mxu1 %v2762_v33  ;;  %v2823_v27 = vld [vmem:[#allocation2 + $0x2a0] sm:$0xff]   ;;  %v2826_v30 = vld [vmem:[#allocation2 + $0x2e8] sm:$0xff]   ;;  %v2829_v33 = vld [vmem:[#allocation2 + $0x230] sm:$0xff]  }
  0x33   :  { %1553 = vmatmul.mubr.bf16.vlgmr.msra.gmra.mrb[0].mxu0 %v2759_v31  ;;  %2482 = vmatprep.subr.bf16.mxu1 %v2768_v38  ;;  %v2827_v31 = vld [vmem:[#allocation2 + $0x2a8] sm:$0xff]   ;;  %v2832_v36 = vld [vmem:[#allocation2 + $0x278] sm:$0xff]  }
  0x34   :  { %2461 = vmatpush3.bf16.msra.mxu0 %v2767_v37  ;;  %1634 = vmatprep.mubr.bf16.mxu0 %v2799_v4  ;;  %v2833_v37 = vld [vmem:[#allocation2 + $0x238] sm:$0xff]   ;;  %v2866_v4 = vld [vmem:[#allocation2 + $0x370] sm:$0xff]  }
  0x35   :  { %1594 = vmatmul.mubr.bf16.vlgmr.msra.gmra.mrb[0].mxu1 %v2764_v35  ;;  %2462 = vmatprep.subr.bf16.mxu0 %v2770_v40  ;;  %v2831_v35 = vld [vmem:[#allocation2 + $0x2b0] sm:$0xff]   ;;  %v2834_v38 = vld [vmem:[#allocation2 + $0x2f8] sm:$0xff]  }
  0x36   :  { %2483 = vmatpush3.bf16.msra.mxu1 %v2769_v39  ;;  %1675 = vmatprep.mubr.bf16.mxu1 %v2804_v8  ;;  %v2835_v39 = vld [vmem:[%s3180_s0 + $0x20] ss:$84 sps:$4 sm:$0xff]   ;;  %v2837_v40 = vld [vmem:[%s3180_s0 + $0x24] ss:$84 sps:$4 sm:$0xff]  }
  0x37   :  { %2484 = vmatprep.subr.bf16.mxu1 %v2772_v42  ;;  %v2839_v42 = vld [vmem:[#allocation2 + $0x340] sm:$0xff]   ;;  %v2870_v8 = vld [vmem:[#allocation2 + $0x378] sm:$0xff]  }
  0x38   :  { %2463 = vmatpush3.bf16.msra.mxu0 %v2771_v41  ;;  %v2838_v41 = vld [vmem:[#allocation2 + $0x2b8] sm:$0xff]  }
  0x39   :  { %2464 = vmatprep.subr.bf16.mxu0 %v2774_v44  ;;  %v2842_v44 = vld [vmem:[%s3180_s0 + $0x2c] ss:$84 sps:$4 sm:$0xff]  }
  0x3a   :  { %2485 = vmatpush3.bf16.msra.mxu1 %v2773_v43  ;;  %v2840_v43 = vld [vmem:[%s3180_s0 + $0x28] ss:$84 sps:$4 sm:$0xff]  }
  0x3b   :  { %2486 = vmatprep.subr.bf16.mxu1 %v2776_v46  ;;  %v2844_v46 = vld [vmem:[#allocation2 + $0x3c0] sm:$0xff]  }
  0x3c   :  { %2465 = vmatpush3.bf16.msra.mxu0 %v2775_v45  ;;  %v2843_v45 = vld [vmem:[#allocation2 + $0x300] sm:$0xff]  }
  0x3d   :  { %2466 = vmatprep.subr.bf16.mxu0 %v2778_v48  ;;  %v2846_v48 = vld [vmem:[#allocation2 + $0x348] sm:$0xff]  }
  0x3e   :  { %2487 = vmatpush3.bf16.msra.mxu1 %v2777_v47  ;;  %v2845_v47 = vld [vmem:[#allocation2 + $0x380] sm:$0xff]  }
  0x3f   :  { %2488 = vmatprep.subr.bf16.mxu1 %v2780_v50  ;;  %v2848_v50 = vld [vmem:[#allocation2 + $0x3c8] sm:$0xff]  }
  0x40   :  { %2467 = vmatpush3.bf16.msra.mxu0 %v2779_v49  ;;  %v2847_v49 = vld [vmem:[#allocation2 + $0x308] sm:$0xff]  }
  0x41   :  { %2468 = vmatprep.subr.bf16.mxu0 %v2782_v52  ;;  %v2850_v52 = vld [vmem:[#allocation2 + $0x350] sm:$0xff]  }
  0x42   :  { %2489 = vmatpush3.bf16.msra.mxu1 %v2781_v51  ;;  %v2849_v51 = vld [vmem:[#allocation2 + $0x388] sm:$0xff]  }
  0x43   :  { %2490 = vmatprep.subr.bf16.mxu1 %v2784_v54  ;;  %v2852_v54 = vld [vmem:[#allocation2 + $0x3d0] sm:$0xff]  }
  0x44   :  { %2469 = vmatpush3.bf16.msra.mxu0 %v2783_v53  ;;  %v2851_v53 = vld [vmem:[#allocation2 + $0x310] sm:$0xff]  }
  0x45   :  { %2470 = vmatprep.subr.bf16.mxu0 %v2786_v56  ;;  %v2854_v56 = vld [vmem:[#allocation2 + $0x358] sm:$0xff]  }
  0x46   :  { %2491 = vmatpush3.bf16.msra.mxu1 %v2785_v55  ;;  %v2853_v55 = vld [vmem:[#allocation2 + $0x390] sm:$0xff]  }
  0x47   :  { %2492 = vmatprep.subr.bf16.mxu1 %v2788_v58  ;;  %v2856_v58 = vld [vmem:[#allocation2 + $0x3d8] sm:$0xff]  }
  0x48   :  { %2471 = vmatpush3.bf16.msra.mxu0 %v2787_v57  ;;  %v2855_v57 = vld [vmem:[#allocation2 + $0x318] sm:$0xff]  }
  0x49   :  { %2472 = vmatprep.subr.bf16.mxu0 %v2790_v60  ;;  %v2858_v60 = vld [vmem:[#allocation2 + $0x360] sm:$0xff]  }
  0x4a   :  { %2493 = vmatpush3.bf16.msra.mxu1 %v2789_v59  ;;  %v2857_v59 = vld [vmem:[#allocation2 + $0x398] sm:$0xff]  }
  0x4b   :  { %2494 = vmatprep.subr.bf16.mxu1 %v2792_v62  ;;  %v2860_v62 = vld [vmem:[#allocation2 + $0x3e0] sm:$0xff]  }
  0x4c   :  { %2473 = vmatpush3.bf16.msra.mxu0 %v2791_v61  ;;  %v2859_v61 = vld [vmem:[#allocation2 + $0x320] sm:$0xff]  }
  0x4d   :  { %2474 = vmatprep.subr.bf16.mxu0 %v2794_v0  ;;  %v2862_v0 = vld [vmem:[#allocation2 + $0x368] sm:$0xff]  }
  0x4e   :  { %2495 = vmatpush3.bf16.msra.mxu1 %v2793_v63  ;;  %v2861_v63 = vld [vmem:[#allocation2 + $0x3a0] sm:$0xff]  }
  0x4f   :  { %2496 = vmatprep.subr.bf16.mxu1 %v2796_v2  ;;  %v2864_v2 = vld [vmem:[#allocation2 + $0x3e8] sm:$0xff]  }
  0x50   :  { %2475 = vmatpush3.bf16.msra.mxu0 %v2795_v1  ;;  %v2863_v1 = vld [vmem:[#allocation2 + $0x328] sm:$0xff]  }
  0x51   :  { %2504 = vmatprep.subr.bf16.mxu0 %v2801_v6  ;;  %v2868_v6 = vld [vmem:[#allocation2 + $0x3f0] sm:$0xff]  }
  0x52   :  { %2497 = vmatpush3.bf16.msra.mxu1 %v2800_v5  ;;  %v2867_v5 = vld [vmem:[#allocation2 + $0x330] sm:$0xff]  }
  0x53   :  { %1635 = vmatmul.mubr.bf16.vlgmr.msra.gmra.mrb[4].mxu0 %v2797_v3  ;;  %2526 = vmatprep.subr.bf16.mxu1 %v2806_v10  ;;  %v2865_v3 = vld [vmem:[#allocation2 + $0x3a8] sm:$0xff]   ;;  %v2872_v10 = vld [vmem:[#allocation2 + $0x3f8] sm:$0xff]  }
  0x54   :  { %2505 = vmatpush3.bf16.msra.mxu0 %v2805_v9  ;;  %1716 = vmatprep.mubr.bf16.mxu0 %v2837_v40  ;;  %v2871_v9 = vld [vmem:[#allocation2 + $0x338] sm:$0xff]   ;;  %v2904_v40 = vld [vmem:[#allocation2 + $0x470] sm:$0xff]  }
  0x55   :  { %1676 = vmatmul.mubr.bf16.vlgmr.msra.gmra.mrb[4].mxu1 %v2802_v7  ;;  %2506 = vmatprep.subr.bf16.mxu0 %v2808_v12  ;;  %v2869_v7 = vld [vmem:[#allocation2 + $0x3b0] sm:$0xff]  }
  0x56   :  { %2527 = vmatpush3.bf16.msra.mxu1 %v2807_v11  ;;  %1757 = vmatprep.mubr.bf16.mxu1 %v2842_v44  ;;  %v2873_v11 = vld [vmem:[%s3180_s0 + $0x30] ss:$84 sps:$4 sm:$0xff]   ;;  %v2875_v12 = vld [vmem:[%s3180_s0 + $0x34] ss:$84 sps:$4 sm:$0xff]   ;;  %v2908_v44 = vld [vmem:[#allocation2 + $0x478] sm:$0xff]  }
  0x57   :  { %2528 = vmatprep.subr.bf16.mxu1 %v2810_v14  ;;  %v2877_v14 = vld [vmem:[#allocation2 + $0x440] sm:$0xff]  }
  0x58   :  { %2507 = vmatpush3.bf16.msra.mxu0 %v2809_v13  ;;  %v2876_v13 = vld [vmem:[#allocation2 + $0x3b8] sm:$0xff]  }
  0x59   :  { %2508 = vmatprep.subr.bf16.mxu0 %v2812_v16  ;;  %v2880_v16 = vld [vmem:[%s3180_s0 + $0x3c] ss:$84 sps:$4 sm:$0xff]  }
  0x5a   :  { %2529 = vmatpush3.bf16.msra.mxu1 %v2811_v15  ;;  %v2878_v15 = vld [vmem:[%s3180_s0 + $0x38] ss:$84 sps:$4 sm:$0xff]  }
  0x5b   :  { %2530 = vmatprep.subr.bf16.mxu1 %v2814_v18  ;;  %v2882_v18 = vld [vmem:[#allocation2 + $0x4c0] sm:$0xff]  }
  0x5c   :  { %2509 = vmatpush3.bf16.msra.mxu0 %v2813_v17  ;;  %v2881_v17 = vld [vmem:[#allocation2 + $0x400] sm:$0xff]  }
  0x5d   :  { %2510 = vmatprep.subr.bf16.mxu0 %v2816_v20  ;;  %v2884_v20 = vld [vmem:[#allocation2 + $0x448] sm:$0xff]  }
  0x5e   :  { %2531 = vmatpush3.bf16.msra.mxu1 %v2815_v19  ;;  %v2883_v19 = vld [vmem:[#allocation2 + $0x480] sm:$0xff]  }
  0x5f   :  { %2532 = vmatprep.subr.bf16.mxu1 %v2818_v22  ;;  %v2886_v22 = vld [vmem:[#allocation2 + $0x4c8] sm:$0xff]  }
  0x60   :  { %2511 = vmatpush3.bf16.msra.mxu0 %v2817_v21  ;;  %v2885_v21 = vld [vmem:[#allocation2 + $0x408] sm:$0xff]  }
  0x61   :  { %2512 = vmatprep.subr.bf16.mxu0 %v2820_v24  ;;  %v2888_v24 = vld [vmem:[#allocation2 + $0x450] sm:$0xff]  }
  0x62   :  { %2533 = vmatpush3.bf16.msra.mxu1 %v2819_v23  ;;  %v2887_v23 = vld [vmem:[#allocation2 + $0x488] sm:$0xff]  }
  0x63   :  { %2534 = vmatprep.subr.bf16.mxu1 %v2822_v26  ;;  %v2890_v26 = vld [vmem:[#allocation2 + $0x4d0] sm:$0xff]  }
  0x64   :  { %2513 = vmatpush3.bf16.msra.mxu0 %v2821_v25  ;;  %v2889_v25 = vld [vmem:[#allocation2 + $0x410] sm:$0xff]  }
  0x65   :  { %2514 = vmatprep.subr.bf16.mxu0 %v2824_v28  ;;  %v2892_v28 = vld [vmem:[#allocation2 + $0x458] sm:$0xff]  }
  0x66   :  { %2535 = vmatpush3.bf16.msra.mxu1 %v2823_v27  ;;  %v2891_v27 = vld [vmem:[#allocation2 + $0x490] sm:$0xff]  }
  0x67   :  { %2536 = vmatprep.subr.bf16.mxu1 %v2826_v30  ;;  %v2894_v30 = vld [vmem:[#allocation2 + $0x4d8] sm:$0xff]  }
  0x68   :  { %2515 = vmatpush3.bf16.msra.mxu0 %v2825_v29  ;;  %v2893_v29 = vld [vmem:[#allocation2 + $0x418] sm:$0xff]  }
  0x69   :  { %2516 = vmatprep.subr.bf16.mxu0 %v2828_v32  ;;  %v2896_v32 = vld [vmem:[#allocation2 + $0x460] sm:$0xff]  }
  0x6a   :  { %2537 = vmatpush3.bf16.msra.mxu1 %v2827_v31  ;;  %v2895_v31 = vld [vmem:[#allocation2 + $0x498] sm:$0xff]  }
  0x6b   :  { %2538 = vmatprep.subr.bf16.mxu1 %v2830_v34  ;;  %v2898_v34 = vld [vmem:[#allocation2 + $0x4e0] sm:$0xff]  }
  0x6c   :  { %2517 = vmatpush3.bf16.msra.mxu0 %v2829_v33  ;;  %v2897_v33 = vld [vmem:[#allocation2 + $0x420] sm:$0xff]  }
  0x6d   :  { %2518 = vmatprep.subr.bf16.mxu0 %v2832_v36  ;;  %v2900_v36 = vld [vmem:[#allocation2 + $0x468] sm:$0xff]  }
  0x6e   :  { %2539 = vmatpush3.bf16.msra.mxu1 %v2831_v35  ;;  %v2899_v35 = vld [vmem:[#allocation2 + $0x4a0] sm:$0xff]  }
  0x6f   :  { %2540 = vmatprep.subr.bf16.mxu1 %v2834_v38  ;;  %v2902_v38 = vld [vmem:[#allocation2 + $0x4e8] sm:$0xff]  }
  0x70   :  { %2519 = vmatpush3.bf16.msra.mxu0 %v2833_v37  ;;  %v2901_v37 = vld [vmem:[#allocation2 + $0x428] sm:$0xff]  }
  0x71   :  { %2548 = vmatprep.subr.bf16.mxu0 %v2839_v42  ;;  %v2906_v42 = vld [vmem:[#allocation2 + $0x4f0] sm:$0xff]  }
  0x72   :  { %2541 = vmatpush3.bf16.msra.mxu1 %v2838_v41  ;;  %v2905_v41 = vld [vmem:[#allocation2 + $0x430] sm:$0xff]  }
  0x73   :  { %1717 = vmatmul.mubr.bf16.vlgmr.msra.gmra.mrb[8].mxu0 %v2835_v39  ;;  %2570 = vmatprep.subr.bf16.mxu1 %v2844_v46  ;;  %v2903_v39 = vld [vmem:[#allocation2 + $0x4a8] sm:$0xff]   ;;  %v2910_v46 = vld [vmem:[#allocation2 + $0x4f8] sm:$0xff]  }
  0x74   :  { %2549 = vmatpush3.bf16.msra.mxu0 %v2843_v45  ;;  %1798 = vmatprep.mubr.bf16.mxu0 %v2875_v12  ;;  %v2909_v45 = vld [vmem:[#allocation2 + $0x438] sm:$0xff]  }
  0x75   :  { %1758 = vmatmul.mubr.bf16.vlgmr.msra.gmra.mrb[8].mxu1 %v2840_v43  ;;  %2550 = vmatprep.subr.bf16.mxu0 %v2846_v48  ;;  %v2907_v43 = vld [vmem:[#allocation2 + $0x4b0] sm:$0xff]   ;;  %v2913_v48 = vld [vmem:[%s3180_s0 + $0x44] ss:$84 sps:$4 sm:$0xff]  }
  0x76   :  { %2571 = vmatpush3.bf16.msra.mxu1 %v2845_v47  ;;  %1839 = vmatprep.mubr.bf16.mxu1 %v2880_v16  ;;  %v2911_v47 = vld [vmem:[%s3180_s0 + $0x40] ss:$84 sps:$4 sm:$0xff]   ;;  %v2928_v16 = vld [vmem:[%s3183_s3 + $0x8] sm:$0xff]  }
  0x77   :  { %2572 = vmatprep.subr.bf16.mxu1 %v2848_v50  ;;  %v2970_v50 = vmov 0.0  }
  0x78   :  { %2551 = vmatpush3.bf16.msra.mxu0 %v2847_v49  ;;  %v2914_v49 = vld [vmem:[#allocation2 + $0x4b8] sm:$0xff]  }
  0x79   :  { %2552 = vmatprep.subr.bf16.mxu0 %v2850_v52  ;;  %v2917_v52 = vld [vmem:[%s3180_s0 + $0x4c] ss:$84 sps:$4 sm:$0xff]  }
  0x7a   :  { %2573 = vmatpush3.bf16.msra.mxu1 %v2849_v51  ;;  %v2915_v51 = vld [vmem:[%s3180_s0 + $0x48] ss:$84 sps:$4 sm:$0xff]  }
  0x7b   :  { %2574 = vmatprep.subr.bf16.mxu1 %v2852_v54  ;;  %v2919_v54 = vld [vmem:[#allocation2 + $0x508] sm:$0xff]  }
  0x7c   :  { %2553 = vmatpush3.bf16.msra.mxu0 %v2851_v53  ;;  %v2918_v53 = vld [vmem:[#allocation2 + $0x500] sm:$0xff]  }
  0x7d   :  { %2554 = vmatprep.subr.bf16.mxu0 %v2854_v56  ;;  %v2921_v56 = vld [vmem:[#allocation2 + $0x518] sm:$0xff]  }
  0x7e   :  { %2575 = vmatpush3.bf16.msra.mxu1 %v2853_v55  ;;  %v2920_v55 = vld [vmem:[#allocation2 + $0x510] sm:$0xff]  }
  0x7f   :  { %2576 = vmatprep.subr.bf16.mxu1 %v2856_v58  ;;  %v2923_v58 = vld [vmem:[#allocation2 + $0x528] sm:$0xff]  }
  0x80   :  { %2555 = vmatpush3.bf16.msra.mxu0 %v2855_v57  ;;  %v2922_v57 = vld [vmem:[#allocation2 + $0x520] sm:$0xff]  }
  0x81   :  { %2556 = vmatprep.subr.bf16.mxu0 %v2858_v60  ;;  %v2925_v60 = vld [vmem:[#allocation2 + $0x538] sm:$0xff]  }
  0x82   :  { %2577 = vmatpush3.bf16.msra.mxu1 %v2857_v59  ;;  %v2924_v59 = vld [vmem:[#allocation2 + $0x530] sm:$0xff]  }
  0x83   :  { %2578 = vmatprep.subr.bf16.mxu1 %v2860_v62 }
  0x84   :  { %2557 = vmatpush3.bf16.msra.mxu0 %v2859_v61  ;;  %v2926_v61 = vld [vmem:[%s3180_s0 + $0x50] ss:$84 sps:$4 sm:$0xff]  }
  0x85   :  { %2558 = vmatprep.subr.bf16.mxu0 %v2862_v0 }
  0x86   :  { %2579 = vmatpush3.bf16.msra.mxu1 %v2861_v63  ;;  %v2208_v63 = vld [vmem:[%s3182_s2] ss:$0 sm:$0xff] }
  0x87   :  { %2580 = vmatprep.subr.bf16.mxu1 %v2864_v2 }
  0x88   :  { %2559 = vmatpush3.bf16.msra.mxu0 %v2863_v1 }
  0x89   :  { %2560 = vmatprep.subr.bf16.mxu0 %v2866_v4 }
  0x8a   :  { %2581 = vmatpush3.bf16.msra.mxu1 %v2865_v3 }
  0x8b   :  { %2582 = vmatprep.subr.bf16.mxu1 %v2868_v6 }
  0x8c   :  { %2561 = vmatpush3.bf16.msra.mxu0 %v2867_v5 }
  0x8d   :  { %2562 = vmatprep.subr.bf16.mxu0 %v2870_v8 }
  0x8e   :  { %2583 = vmatpush3.bf16.msra.mxu1 %v2869_v7 }
  0x8f   :  { %2584 = vmatprep.subr.bf16.mxu1 %v2872_v10 }
  0x90   :  { %2563 = vmatpush3.bf16.msra.mxu0 %v2871_v9 }
  0x91   :  { %2592 = vmatprep.subr.bf16.mxu0 %v2877_v14 }
  0x92   :  { %2585 = vmatpush3.bf16.msra.mxu1 %v2876_v13 }
  0x93   :  { %1799 = vmatmul.mubr.bf16.vlgmr.msra.gmra.mrb[12].mxu0 %v2873_v11  ;;  %2614 = vmatprep.subr.bf16.mxu1 %v2882_v18  ;;  %v2930_v18 = vld [vmem:[%s3183_s3 + $0x18] sm:$0xff]  }
  0x94   :  { %2593 = vmatpush3.bf16.msra.mxu0 %v2881_v17  ;;  %1880 = vmatprep.mubr.bf16.mxu0 %v2913_v48  ;;  %v2929_v17 = vld [vmem:[%s3183_s3 + $0x10] sm:$0xff]   ;;  %v2940_v48 = vld [vmem:[%s3185_s5 + $0x28] sm:$0xff]  }
  0x95   :  { %1840 = vmatmul.mubr.bf16.vlgmr.msra.gmra.mrb[12].mxu1 %v2878_v15  ;;  %2594 = vmatprep.subr.bf16.mxu0 %v2884_v20  ;;  %v2927_v15 = vld [vmem:[%s3183_s3] sm:$0xff]  }
  0x96   :  { %2615 = vmatpush3.bf16.msra.mxu1 %v2883_v19  ;;  %1921 = vmatprep.mubr.bf16.mxu1 %v2917_v52  ;;  %v2931_v19 = vld [vmem:[%s3183_s3 + $0x20] sm:$0xff]  }
  0x97   :  { %2616 = vmatprep.subr.bf16.mxu1 %v2886_v22  ;;  %v2932_v22 = vld [vmem:[%s3183_s3 + $0x28] sm:$0xff]  }
  0x98   :  { %2595 = vmatpush3.bf16.msra.mxu0 %v2885_v21 }
  0x99   :  { %2596 = vmatprep.subr.bf16.mxu0 %v2888_v24 }
  0x9a   :  { %2617 = vmatpush3.bf16.msra.mxu1 %v2887_v23 }
  0x9b   :  { %2618 = vmatprep.subr.bf16.mxu1 %v2890_v26 }
  0x9c   :  { %2597 = vmatpush3.bf16.msra.mxu0 %v2889_v25 }
  0x9d   :  { %2598 = vmatprep.subr.bf16.mxu0 %v2892_v28 }
  0x9e   :  { %2619 = vmatpush3.bf16.msra.mxu1 %v2891_v27 }
  0x9f   :  { %2620 = vmatprep.subr.bf16.mxu1 %v2894_v30 }
  0xa0   :  { %2599 = vmatpush3.bf16.msra.mxu0 %v2893_v29 }
  0xa1   :  { %2600 = vmatprep.subr.bf16.mxu0 %v2896_v32 }
  0xa2   :  { %2621 = vmatpush3.bf16.msra.mxu1 %v2895_v31 }
  0xa3   :  { %2622 = vmatprep.subr.bf16.mxu1 %v2898_v34 }
  0xa4   :  { %2601 = vmatpush3.bf16.msra.mxu0 %v2897_v33 }
  0xa5   :  { %2602 = vmatprep.subr.bf16.mxu0 %v2900_v36 }
  0xa6   :  { %2623 = vmatpush3.bf16.msra.mxu1 %v2899_v35 }
  0xa7   :  { %2624 = vmatprep.subr.bf16.mxu1 %v2902_v38  ;;  %v2934_v38 = vld [vmem:[%s3183_s3 + $0x38] sm:$0xff]  }
  0xa8   :  { %2603 = vmatpush3.bf16.msra.mxu0 %v2901_v37  ;;  %v2933_v37 = vld [vmem:[%s3183_s3 + $0x30] sm:$0xff]  }
  0xa9   :  { %2604 = vmatprep.subr.bf16.mxu0 %v2904_v40  ;;  %v2936_v40 = vld [vmem:[%s3185_s5 + $0x8] sm:$0xff]  }
  0xaa   :  { %2625 = vmatpush3.bf16.msra.mxu1 %v2903_v39  ;;  %v2935_v39 = vld [vmem:[%s3185_s5] sm:$0xff]  }
  0xab   :  { %2626 = vmatprep.subr.bf16.mxu1 %v2906_v42  ;;  %v2938_v42 = vld [vmem:[%s3185_s5 + $0x18] sm:$0xff]  }
  0xac   :  { %2605 = vmatpush3.bf16.msra.mxu0 %v2905_v41  ;;  %v2937_v41 = vld [vmem:[%s3185_s5 + $0x10] sm:$0xff]  }
  0xad   :  { %2606 = vmatprep.subr.bf16.mxu0 %v2908_v44 }
  0xae   :  { %2627 = vmatpush3.bf16.msra.mxu1 %v2907_v43  ;;  %v2939_v43 = vld [vmem:[%s3185_s5 + $0x20] sm:$0xff]  }
  0xaf   :  { %2628 = vmatprep.subr.bf16.mxu1 %v2910_v46 }
  0xb0   :  { %2607 = vmatpush3.bf16.msra.mxu0 %v2909_v45 }
  0xb1   :  { %2663 = vmatprep.subr.bf16.mxu0 %v2970_v50 }
  0xb2   :  { %2629 = vmatpush3.bf16.msra.mxu1 %v2914_v49 }
  0xb3   :  { %1881 = vmatmul.mubr.bf16.vlgmr.msra.gmra.mrb[16].mxu0 %v2911_v47  ;;  %2683 = vmatprep.subr.bf16.mxu1 %v2970_v50 }
  0xb4   :  { %2679 = vmatprep.mubr.msk.bf16.mxu0 %vm2971_vm0, %v2970_v50  ;;  %2664 = vmatpush3.bf16.msra.mxu0 %v2918_v53 }
  0xb5   :  { %1922 = vmatmul.mubr.bf16.vlgmr.msra.gmra.mrb[16].mxu1 %v2915_v51  ;;  %2665 = vmatprep.subr.bf16.mxu0 %v2970_v50 }
  0xb6   :  { %2699 = vmatprep.mubr.msk.bf16.mxu1 %vm2971_vm0, %v2970_v50  ;;  %2684 = vmatpush3.bf16.msra.mxu1 %v2927_v15 }
  0xb7   :  { %2685 = vmatprep.subr.bf16.mxu1 %v2970_v50 }
  0xb8   :  { %2666 = vmatpush3.bf16.msra.mxu0 %v2919_v54 }
  0xb9   :  { %2667 = vmatprep.subr.bf16.mxu0 %v2970_v50 }
  0xba   :  { %2686 = vmatpush3.bf16.msra.mxu1 %v2928_v16 }
  0xbb   :  { %2687 = vmatprep.subr.bf16.mxu1 %v2970_v50 }
  0xbc   :  { %2668 = vmatpush3.bf16.msra.mxu0 %v2920_v55 }
  0xbd   :  { %2669 = vmatprep.subr.bf16.mxu0 %v2970_v50 }
  0xbe   :  { %2688 = vmatpush3.bf16.msra.mxu1 %v2929_v17 }
  0xbf   :  { %2689 = vmatprep.subr.bf16.mxu1 %v2970_v50 }
  0xc0   :  { %2670 = vmatpush3.bf16.msra.mxu0 %v2921_v56 }
  0xc1   :  { %2671 = vmatprep.subr.bf16.mxu0 %v2970_v50 }
  0xc2   :  { %2690 = vmatpush3.bf16.msra.mxu1 %v2930_v18 }
  0xc3   :  { %2691 = vmatprep.subr.bf16.mxu1 %v2970_v50 }
  0xc4   :  { %2672 = vmatpush3.bf16.msra.mxu0 %v2922_v57 }
  0xc5   :  { %2673 = vmatprep.subr.bf16.mxu0 %v2970_v50 }
  0xc6   :  { %2692 = vmatpush3.bf16.msra.mxu1 %v2931_v19 }
  0xc7   :  { %2693 = vmatprep.subr.bf16.mxu1 %v2970_v50 }
  0xc8   :  { %2674 = vmatpush3.bf16.msra.mxu0 %v2923_v58 }
  0xc9   :  { %2675 = vmatprep.subr.bf16.mxu0 %v2970_v50 }
  0xca   :  { %2694 = vmatpush3.bf16.msra.mxu1 %v2932_v22 }
  0xcb   :  { %2695 = vmatprep.subr.bf16.mxu1 %v2970_v50 }
  0xcc   :  { %2676 = vmatpush3.bf16.msra.mxu0 %v2924_v59 }
  0xcd   :  { %2677 = vmatprep.subr.bf16.mxu0 %v2970_v50 }
  0xce   :  { %2696 = vmatpush3.bf16.msra.mxu1 %v2933_v37 }
  0xcf   :  { %2697 = vmatprep.subr.bf16.mxu1 %v2970_v50 }
  0xd0   :  { %2678 = vmatpush3.bf16.msra.mxu0 %v2925_v60 }
  0xd1   :  { %2703 = vmatprep.subr.bf16.mxu0 %v2970_v50 }
  0xd2   :  { %2698 = vmatpush3.bf16.msra.mxu1 %v2934_v38 }
  0xd3   :  { %2680 = vmatmul.mubr.bf16.vlgmr.msra.gmra.mrb[20].mxu0 %v2926_v61 }
  0xd4   :  { %2719 = vmatprep.mubr.msk.bf16.mxu0 %vm2971_vm0, %v2970_v50  ;;  %2704 = vmatpush3.bf16.msra.mxu0 %v2935_v39  ;;  %v2941_v39 = vld [vmem:[%s3185_s5 + $0x30] sm:$0xff]  }
  0xd5   :  { %2705 = vmatprep.subr.bf16.mxu0 %v2970_v50 }
  0xd8   :  { %2706 = vmatpush3.bf16.msra.mxu0 %v2936_v40  ;;  %v2942_v40 = vld [vmem:[%s3185_s5 + $0x38] sm:$0xff]  }
  0xd9   :  { %2707 = vmatprep.subr.bf16.mxu0 %v2970_v50 }
  0xdc   :  { %2708 = vmatpush3.bf16.msra.mxu0 %v2937_v41  ;;  %v2398_v41 = vld [vmem:[%s3184_s4] ss:$0 sm:$0xff] }
  0xdd   :  { %2709 = vmatprep.subr.bf16.mxu0 %v2970_v50 }
  0xe0   :  { %2710 = vmatpush3.bf16.msra.mxu0 %v2938_v42 }
  0xe1   :  { %2711 = vmatprep.subr.bf16.mxu0 %v2970_v50 }
  0xe4   :  { %2712 = vmatpush3.bf16.msra.mxu0 %v2939_v43 }
  0xe5   :  { %2713 = vmatprep.subr.bf16.mxu0 %v2970_v50 }
  0xe8   :  { %2714 = vmatpush3.bf16.msra.mxu0 %v2940_v48 }
  0xe9   :  { %2715 = vmatprep.subr.bf16.mxu0 %v2970_v50 }
  0xec   :  { %2716 = vmatpush3.bf16.msra.mxu0 %v2941_v39 }
  0xed   :  { %2717 = vmatprep.subr.bf16.mxu0 %v2970_v50  ;;  %v2407_v50 = vld [vmem:[%s3186_s6] ss:$0 sm:$0xff] }
  0xf0   :  { %2718 = vmatpush3.bf16.msra.mxu0 %v2942_v40 }
 0x106   :  { %v2432_v62 = vpop.f32.mrb[0].mxu0 }
 0x107   :  { %v2433_v0 = vpop.f32.mrb[1].mxu0 }
 0x108   :  { %v2434_v1 = vadd.f32 %v2433_v0, %v2432_v62  ;;  %v2435_v2 = vpop.f32.mrb[2].mxu0  ;;  %v2454_v3 = vpop.f32.mrb[0].mxu1 }
 0x109   :  { %v2436_v4 = vpop.f32.mrb[3].mxu0  ;;  %v2455_v7 = vpop.f32.mrb[1].mxu1 }
 0x10a   :  { %v1555_v5 = vadd.f32 %v2434_v1, %v2208_v63  ;;  %v2437_v6 = vadd.f32 %v2436_v4, %v2435_v2  ;;  %v2456_v8 = vadd.f32 %v2455_v7, %v2454_v3  ;;  %v2457_v9 = vpop.f32.mrb[2].mxu1 }
 0x10b   :  { %v2458_v11 = vpop.f32.mrb[3].mxu1 }
 0x10c   :  { %v1558_v10 = vadd.f32 %v2437_v6, %v2208_v63  ;;  %v1596_v12 = vadd.f32 %v2456_v8, %v1555_v5  ;;  %v2459_v13 = vadd.f32 %v2458_v11, %v2457_v9 }
 0x10e   :  { %v1599_v14 = vadd.f32 %v2459_v13, %v1558_v10 }
 0x126   :  { %v2476_v20 = vpop.f32.mrb[4].mxu0 }
 0x127   :  { %v2477_v21 = vpop.f32.mrb[5].mxu0 }
 0x128   :  { %v2478_v23 = vadd.f32 %v2477_v21, %v2476_v20  ;;  %v2479_v24 = vpop.f32.mrb[6].mxu0  ;;  %v2498_v27 = vpop.f32.mrb[4].mxu1 }
 0x129   :  { %v2480_v25 = vpop.f32.mrb[7].mxu0  ;;  %v2499_v29 = vpop.f32.mrb[5].mxu1 }
 0x12a   :  { %v1637_v26 = vadd.f32 %v2478_v23, %v1596_v12  ;;  %v2481_v28 = vadd.f32 %v2480_v25, %v2479_v24  ;;  %v2500_v31 = vadd.f32 %v2499_v29, %v2498_v27  ;;  %v2501_v32 = vpop.f32.mrb[6].mxu1 }
 0x12b   :  { %v2502_v33 = vpop.f32.mrb[7].mxu1 }
 0x12c   :  { %v1640_v30 = vadd.f32 %v2481_v28, %v1599_v14  ;;  %v1678_v34 = vadd.f32 %v2500_v31, %v1637_v26  ;;  %v2503_v35 = vadd.f32 %v2502_v33, %v2501_v32 }
 0x12e   :  { %v1681_v36 = vadd.f32 %v2503_v35, %v1640_v30 }
 0x146   :  { %v2520_v44 = vpop.f32.mrb[8].mxu0 }
 0x147   :  { %v2521_v45 = vpop.f32.mrb[9].mxu0 }
 0x148   :  { %v2522_v46 = vadd.f32 %v2521_v45, %v2520_v44  ;;  %v2523_v47 = vpop.f32.mrb[10].mxu0  ;;  %v2542_v49 = vpop.f32.mrb[8].mxu1 }
 0x149   :  { %v2524_v51 = vpop.f32.mrb[11].mxu0  ;;  %v2543_v54 = vpop.f32.mrb[9].mxu1 }
 0x14a   :  { %v1719_v52 = vadd.f32 %v2522_v46, %v1678_v34  ;;  %v2525_v53 = vadd.f32 %v2524_v51, %v2523_v47  ;;  %v2544_v55 = vadd.f32 %v2543_v54, %v2542_v49  ;;  %v2545_v56 = vpop.f32.mrb[10].mxu1 }
 0x14b   :  { %v2546_v58 = vpop.f32.mrb[11].mxu1 }
 0x14c   :  { %v1722_v57 = vadd.f32 %v2525_v53, %v1681_v36  ;;  %v1760_v59 = vadd.f32 %v2544_v55, %v1719_v52  ;;  %v2547_v60 = vadd.f32 %v2546_v58, %v2545_v56 }
 0x14e   :  { %v1763_v61 = vadd.f32 %v2547_v60, %v1722_v57 }
 0x166   :  { %v2564_v62 = vpop.f32.mrb[12].mxu0 }
 0x167   :  { %v2565_v63 = vpop.f32.mrb[13].mxu0 }
 0x168   :  { %v2566_v0 = vadd.f32 %v2565_v63, %v2564_v62  ;;  %v2567_v1 = vpop.f32.mrb[14].mxu0  ;;  %v2586_v2 = vpop.f32.mrb[12].mxu1 }
 0x169   :  { %v2568_v3 = vpop.f32.mrb[15].mxu0  ;;  %v2587_v6 = vpop.f32.mrb[13].mxu1 }
 0x16a   :  { %v1801_v4 = vadd.f32 %v2566_v0, %v1760_v59  ;;  %v2569_v5 = vadd.f32 %v2568_v3, %v2567_v1  ;;  %v2588_v7 = vadd.f32 %v2587_v6, %v2586_v2  ;;  %v2589_v8 = vpop.f32.mrb[14].mxu1 }
 0x16b   :  { %v2590_v10 = vpop.f32.mrb[15].mxu1 }
 0x16c   :  { %v1804_v9 = vadd.f32 %v2569_v5, %v1763_v61  ;;  %v1842_v11 = vadd.f32 %v2588_v7, %v1801_v4  ;;  %v2591_v12 = vadd.f32 %v2590_v10, %v2589_v8 }
 0x16e   :  { %v1845_v13 = vadd.f32 %v2591_v12, %v1804_v9 }
 0x186   :  { %v2608_v14 = vpop.f32.mrb[16].mxu0 }
 0x187   :  { %v2609_v15 = vpop.f32.mrb[17].mxu0 }
 0x188   :  { %v2610_v16 = vadd.f32 %v2609_v15, %v2608_v14  ;;  %v2611_v17 = vpop.f32.mrb[18].mxu0  ;;  %v2630_v18 = vpop.f32.mrb[16].mxu1 }
 0x189   :  { %v2612_v19 = vpop.f32.mrb[19].mxu0  ;;  %v2631_v22 = vpop.f32.mrb[17].mxu1 }
 0x18a   :  { %v1883_v20 = vadd.f32 %v2610_v16, %v1842_v11  ;;  %v2613_v21 = vadd.f32 %v2612_v19, %v2611_v17  ;;  %v2632_v23 = vadd.f32 %v2631_v22, %v2630_v18  ;;  %v2633_v24 = vpop.f32.mrb[18].mxu1 }
 0x18b   :  { %v2634_v26 = vpop.f32.mrb[19].mxu1 }
 0x18c   :  { %v1886_v25 = vadd.f32 %v2613_v21, %v1845_v13  ;;  %v2635_v27 = vadd.f32 %v2634_v26, %v2633_v24  ;;  %v1924_v28 = vadd.f32 %v2632_v23, %v1883_v20 }
 0x18e   :  { %v1927_v29 = vadd.f32 %v2635_v27, %v1886_v25 }
 0x1a6   :  { %v1964_v30 = vpop.f32.mrb[20].mxu0 }
 0x1a7   :  { %v1965_v31 = vadd.f32 %v1964_v30, %v1924_v28  ;;  %v2681_v32 = vpop.f32.mrb[21].mxu0 }
 0x1a8   :  { %v1967_v33 = vpop.f32.mrb[22].mxu0 }
 0x1a9   :  { %v1968_v34 = vadd.f32 %v1967_v33, %v1927_v29  ;;  %v2682_v35 = vpop.f32.mrb[23].mxu0  ;;  %v1971_v36 = vmax.f32 %v1965_v31, 0.0 }
 0x1ab   :  { %v1972_v37 = vmax.f32 %v1968_v34, 0.0 }
 0x1ad   :  { %v1973_v38 = vpack.c.bf16 %v1972_v37, %v1971_v36 }
 0x1af   :  { %2700 = vmatmul.mubr.bf16.vlgmr.msra.gmra.mrb[20].mxu1 %v1973_v38 }
 0x282   :  { %v2079_v42 = vpop.f32.mrb[20].mxu1 }
 0x283   :  { %v2080_v43 = vadd.f32 %v2398_v41, %v2079_v42  ;;  %v2701_v44 = vpop.f32.mrb[21].mxu1 }
 0x284   :  { %v2082_v45 = vpop.f32.mrb[22].mxu1 }
 0x285   :  { %v2083_v46 = vadd.f32 %v2398_v41, %v2082_v45  ;;  %v2702_v47 = vpop.f32.mrb[23].mxu1  ;;  %v2086_v48 = vmax.f32 %v2080_v43, 0.0 }
 0x287   :  { %v2087_v49 = vmax.f32 %v2083_v46, 0.0 }
 0x289   :  { %v2088_v51 = vpack.c.bf16 %v2087_v49, %v2086_v48 }
 0x28b   :  { %2720 = vmatmul.mubr.bf16.vlgmr.msra.gmra.mrb[24].mxu0 %v2088_v51 }
 0x35e   :  { %v2194_v52 = vpop.f32.mrb[24].mxu0 }
 0x35f   :  { %v2195_v53 = vadd.f32 %v2407_v50, %v2194_v52  ;;  %v2721_v54 = vpop.f32.mrb[25].mxu0 }
 0x360   :  { %v2197_v55 = vpop.f32.mrb[26].mxu0 }
 0x361   :  { %2201 = vst [vmem:[%s3187_s7] sm:$0xff] %v2195_v53  ;;  %v2198_v56 = vadd.f32 %v2407_v50, %v2197_v55  ;;  %v2722_v57 = vpop.f32.mrb[27].mxu0 }
 0x363   :  { %2202 = vst [vmem:[%s3187_s7 + $0x8] sm:$0xff] %v2198_v56 }
 0x364   :  { %2207 = vsyncpa [#allocation3], 1 }

</bundles_post_ra>
